<compile_context>
chip_gen: v7x
topology: tpu7x:2x2x1
jax: 0.10.0
libtpu: 0.0.40
codegen_flags: <defaults>
</compile_context>

<pallas_src>
import functools

import jax
import jax.numpy as jnp
from jax.experimental import pallas as pl
from jax.experimental.pallas import tpu as pltpu


def _corr2d_kernel(w_ref, b_ref, x_ref, o_ref, *, kh, kw):
    """Cross-correlation on one row-tile.

    w_ref : (kh, kw)              SMEM  (scalar taps)
    b_ref : (1,)                  SMEM  (scalar bias)
    x_ref : (tile_h_in,  W)       VMEM
    o_ref : (tile_h_out, w_out)   VMEM
    """
    h_out, w_out = o_ref.shape

    # Hoist scalar reads out of the MAC chain.
    w = [[w_ref[i, j] for j in range(kw)] for i in range(kh)]
    bias = b_ref[0]

    # Tap (0, 0) initialises the accumulator with the bias folded in
    # (saves one full-tile add; no zeros broadcast).
    acc = x_ref[:h_out, :w_out] * w[0][0] + bias
    for di in range(kh):
        for dj in range(kw):
            if di == 0 and dj == 0:
                continue
            acc = acc + x_ref[di:di + h_out, dj:dj + w_out] * w[di][dj]

    o_ref[...] = acc


def conv2dnet_forward(x, weight, bias, *, max_tile_h=256,
                      vmem_budget_bytes=32 << 20):
    """Pallas implementation of Conv2DNet.forward.

    x      : (H, W)   float32
    weight : (kh, kw) float32
    bias   : (1,)     float32
    returns: (H-kh+1, W-kw+1) float32
    """
    x = x.astype(jnp.float32)
    weight = weight.astype(jnp.float32)
    bias = bias.astype(jnp.float32)

    kh, kw = weight.shape
    H, W = x.shape
    h_out, w_out = H - kh + 1, W - kw + 1

    kernel = functools.partial(_corr2d_kernel, kh=kh, kw=kw)
    smem_spec = pl.BlockSpec(memory_space=pltpu.MemorySpace.SMEM)

    def _single_block():
        # Whole image in one block: every block dim equals the full array dim,
        # so no (8, 128) divisibility constraint and no padding is needed.
        in_spec = pl.BlockSpec((H, W), lambda i: (0, 0))
        out_spec = pl.BlockSpec((h_out, w_out), lambda i: (0, 0))
        est = 2 * (H * W + h_out * w_out) * 4
        return (1,), in_spec, out_spec, est

    if kh > 1:
        # TODO(synk): row-halo tiling (overlapping tile_h + kh - 1 row windows)
        # for kh > 1 so tall images stream through VMEM; a single full-height
        # block is used for now and will not scale to large H.
        grid, in_x_spec, out_spec, est_vmem = _single_block()
    else:
        # Bytes per grid step: double-buffered input + output row tiles (f32).
        per_row_bytes = 2 * (W + w_out) * 4
        tile_h = min(max_tile_h, max(8, vmem_budget_bytes // per_row_bytes))
        tile_h -= tile_h % 8
        tile_h = max(tile_h, 8)
        if H >= 16:
            # Guarantee >= 2 grid steps so both v7x TensorCores get work.
            tile_h = min(tile_h, max(8, ((H - 1) // 8) * 8))

        if tile_h >= H:
            grid, in_x_spec, out_spec, est_vmem = _single_block()
        else:
            grid = (pl.cdiv(H, tile_h),)
            in_x_spec = pl.BlockSpec((tile_h, W), lambda i: (i, 0))
            out_spec = pl.BlockSpec((tile_h, w_out), lambda i: (i, 0))
            est_vmem = 2 * tile_h * (W + w_out) * 4

    cp_kwargs = dict(dimension_semantics=("parallel",))
    if est_vmem > (16 << 20):
        # Raise the scoped VMEM limit only when the double-buffered blocks need
        # it (v5e default 16 MiB, v6e/v7x 32 MiB); stays within 64 MiB physical.
        cp_kwargs["vmem_limit_bytes"] = int(
            min(96 << 20, max(32 << 20, est_vmem * 3 // 2)))

    return pl.pallas_call(
        kernel,
        out_shape=jax.ShapeDtypeStruct((h_out, w_out), jnp.float32),
        grid=grid,
        in_specs=[smem_spec, smem_spec, in_x_spec],
        out_specs=out_spec,
        compiler_params=pltpu.CompilerParams(**cp_kwargs),
    )(weight, bias, x)


def _reference(x, weight, bias):
    kh, kw = weight.shape
    h_out = x.shape[0] - kh + 1
    w_out = x.shape[1] - kw + 1
    out = jnp.zeros((h_out, w_out), jnp.float32)
    for di in range(kh):
        for dj in range(kw):
            out = out + x[di:di + h_out, dj:dj + w_out] * weight[di, dj]
    return out + bias[0]


if __name__ == "__main__":
    key = jax.random.PRNGKey(0)
    k_x, k_w = jax.random.split(key)

    # Shapes implied by the module: X.reshape((6, 8)), kernel_size = (1, 2).
    kernel_size = (1, 2)
    x = jax.random.normal(k_x, (6, 8), dtype=jnp.float32)
    weight = jax.random.normal(k_w, kernel_size, dtype=jnp.float32)  # nn.Parameter(randn)
    bias = jnp.zeros((1,), dtype=jnp.float32)                        # nn.Parameter(zeros)

    y = conv2dnet_forward(x, weight, bias)
    jax.block_until_ready(y)

    y_ref = _reference(x, weight, bias)
    assert y.shape == (6, 7), y.shape
    assert jnp.allclose(y, y_ref, atol=1e-5, rtol=1e-5), "mismatch vs reference"

    print("KERNEL_OK")
</pallas_src>

<mosaic_0001>
module attributes {stable_mosaic.version = 11 : i64} {
  func.func @_corr2d_kernel(%arg0: i32, %arg1: memref<1x2xf32, #tpu.memory_space<smem>>, %arg2: memref<1xf32, #tpu.memory_space<smem>>, %arg3: memref<6x8xf32, #tpu.memory_space<vmem>>, %arg4: memref<6x7xf32, #tpu.memory_space<vmem>>) attributes {dimension_semantics = [#tpu.dimension_semantics<parallel>], iteration_bounds = array<i64: 1>, scalar_prefetch = 0 : i64, scratch_operands = 0 : i64, tpu.core_type = #tpu.core_type<tc>, window_params = [{transform_indices = @transform_0, window_bounds = array<i64: 1, 2>}, {transform_indices = @transform_1, window_bounds = array<i64: 1>}, {pipeline_mode = #tpu.pipeline_mode<synchronous>, transform_indices = @transform_2, window_bounds = array<i64: 6, 8>}, {pipeline_mode = #tpu.pipeline_mode<synchronous>, transform_indices = @transform_3, window_bounds = array<i64: 6, 7>}]} {
    %c0 = arith.constant 0 : index
    %c0_0 = arith.constant 0 : index
    %0 = memref.load %arg1[%c0, %c0_0] : memref<1x2xf32, #tpu.memory_space<smem>>
    %c0_1 = arith.constant 0 : index
    %c1 = arith.constant 1 : index
    %1 = memref.load %arg1[%c0_1, %c1] : memref<1x2xf32, #tpu.memory_space<smem>>
    %c0_2 = arith.constant 0 : index
    %2 = memref.load %arg2[%c0_2] : memref<1xf32, #tpu.memory_space<smem>>
    %c0_3 = arith.constant 0 : index
    %c0_4 = arith.constant 0 : index
    %3 = vector.load %arg3[%c0_3, %c0_4] : memref<6x8xf32, #tpu.memory_space<vmem>>, vector<6x7xf32>
    %4 = vector.broadcast %0 : f32 to vector<6x7xf32>
    %5 = arith.mulf %3, %4 : vector<6x7xf32>
    %6 = vector.broadcast %2 : f32 to vector<6x7xf32>
    %7 = arith.addf %5, %6 : vector<6x7xf32>
    %c0_5 = arith.constant 0 : index
    %c1_6 = arith.constant 1 : index
    %8 = vector.load %arg3[%c0_5, %c1_6] : memref<6x8xf32, #tpu.memory_space<vmem>>, vector<6x7xf32>
    %9 = vector.broadcast %1 : f32 to vector<6x7xf32>
    %10 = arith.mulf %8, %9 : vector<6x7xf32>
    %11 = arith.addf %7, %10 : vector<6x7xf32>
    %c0_7 = arith.constant 0 : index
    %c0_8 = arith.constant 0 : index
    %12 = vector.load %arg4[%c0_7, %c0_8] : memref<6x7xf32, #tpu.memory_space<vmem>>, vector<6x7xf32>
    tpu.vector_store %arg4[%c0_7, %c0_8], %11 {strides = array<i32>} : memref<6x7xf32, #tpu.memory_space<vmem>>, vector<6x7xf32>,
    return
  }
  func.func @transform_0(%arg0: i32) -> (i32, i32) {
    %c0_i32 = arith.constant 0 : i32
    %c0_i32_0 = arith.constant 0 : i32
    %c0_i32_1 = arith.constant 0 : i32
    return %c0_i32, %c0_i32_0 : i32, i32
  }
  func.func @transform_1(%arg0: i32) -> i32 {
    %c0_i32 = arith.constant 0 : i32
    %c0_i32_0 = arith.constant 0 : i32
    return %c0_i32 : i32
  }
  func.func @transform_2(%arg0: i32) -> (i32, i32) {
    %c0_i32 = arith.constant 0 : i32
    %c0_i32_0 = arith.constant 0 : i32
    %c0_i32_1 = arith.constant 0 : i32
    return %c0_i32, %c0_i32_0 : i32, i32
  }
  func.func @transform_3(%arg0: i32) -> (i32, i32) {
    %c0_i32 = arith.constant 0 : i32
    %c0_i32_0 = arith.constant 0 : i32
    %c0_i32_1 = arith.constant 0 : i32
    return %c0_i32, %c0_i32_0 : i32, i32
  }
}

</mosaic_0001>

<bundles_post_ra>
// kernel: tpu_custom_call.1
= control target key start
LH: loop header
LB: loop body
LE: loop exit
PB: predicated region body
PF: predicated region fallthrough
CT: control target
= control target key end

     0   :  { %9 = vsyncpa [#allocation6], 0  ;;  %s195_s0 = inlined_call_operand.vmem [shape: f32[1,2], index: 0, kind: input, shape index: {}]   ;;  %s196_s1 = inlined_call_operand.<no memory space> [shape: f32[1], index: 1, kind: input, shape index: {}]   ;;  %s197_s2 = inlined_call_operand.hbm [shape: f32[6,8], index: 2, kind: input, shape index: {}]   ;;  %s198_s3 = inlined_call_operand.hbm [shape: f32[6,7], index: 3, kind: output, shape index: {}]  }
   0x1   :  { %10 = vsyncpa [#allocation4], 0 }
   0x2   :  { %11 = vsyncpa [#allocation5], 0  ;;  %s18_s14 = sshll.u32 %s195_s0, 4  ;;  %s19_s14 = int_to_ptr.vmem [resolvable:$true] %s18_s14 }
   0x3   :  { %s79_s15 = scalar_lea.vmem %s19_s14, 16  ;;  %p84_p1 = scmp.lt.s32.totalorder %s19_s14, %s19_s14 }
   0x4   :  { %p80_p0 = scmp.ne.s32.totalorder %s19_s14, %s79_s15  ;;  %p85_p2 = scmp.lt.s32.totalorder %s79_s15, %s79_s15 }
   0x6   :  { %p86_p3 = por %p85_p2, %p84_p1 }
   0x8   :  { %p87_p4 = pnand %p86_p3, %p80_p0 }
   0xa   :  { %90 = shalt.err (!%p87_p4)
}
   0xb   :  { %s141_s16 = smov [#allocation3]   ;;  %s142_s17 = smov [#allocation7]  }
   0xc   :  { %21 = dma.vmem_to_smem %s19_s14, 16, %s141_s16, [#allocation6]  }
   0xd   :  { %s30_s18 = sshll.u32 %s142_s17, 4  ;;  %s91_s21 = scalar_lea.hbm %s197_s2, 128  ;;  %s31_s18 = int_to_ptr.vmem [resolvable:$true] %s30_s18 }
   0xe   :  { %p92_p5 = scmp.ne.s32.totalorder %s197_s2, %s91_s21  ;;  %p95_p6 = scmp.lt.u32.totalorder %s91_s21, %s197_s2 }
  0x10   :  { %p97_p7 = pnand %p95_p6, %p92_p5 }
  0x12   :  { %100 = shalt.err (!%p97_p7)
}
  0x13   :  { %s101_s25 = scalar_lea.vmem %s31_s18, 128  ;;  %p106_p9 = scmp.lt.s32.totalorder %s31_s18, %s31_s18 }
  0x14   :  { %p102_p8 = scmp.ne.s32.totalorder %s31_s18, %s101_s25  ;;  %p107_p10 = scmp.lt.s32.totalorder %s101_s25, %s101_s25 }
  0x16   :  { %p108_p11 = por %p107_p10, %p106_p9 }
  0x18   :  { %p109_p12 = pnand %p108_p11, %p102_p8 }
  0x1a   :  { %112 = shalt.err (!%p109_p12)
}
  0x1b   :  { %33 = dma.hbm_to_vmem [thread:$0]  %s197_s2, 128, %s31_s18, [#allocation4]  }
  0x1c   :  { %135 = dma.done.wait [#allocation6], 16  }
  0x1d   :  { %136 = vsyncadd [#allocation6], 4294967280 }
  0x1e   :  { %137 = dma.done.wait [#allocation4], 128  }
  0x1f   :  { %138 = vsyncadd [#allocation4], 4294967168 }
  0x20   :  { %40 = sfence }
  0x21   :  { %s74_s28 = sld [smem:[#allocation3 + $0x1]]  ;;  %v44_v0 = vld [vmem:[#allocation7] sm:$0x3f]  ;;  %s143_s29 = smov 127   ;;  %v47_v5 = vstv %s196_s1  ;;  %vm56_vm0 = vcmask 54272  }
  0x22   :  { %s41_s30 = sld [smem:[#allocation3]]  ;;  %s144_s2 = smov [#allocation8]  }
  0x23   :  { %s64_s6 = sshll.u32 %s144_s2, 4  ;;  %s65_s6 = int_to_ptr.vmem [resolvable:$true] %s64_s6 }
  0x24   :  { %s113_s7 = scalar_lea.vmem %s65_s6, 128  ;;  %p118_p0 = scmp.lt.s32.totalorder %s65_s6, %s65_s6 }
  0x25   :  { %p114_p13 = scmp.ne.s32.totalorder %s65_s6, %s113_s7  ;;  %p119_p1 = scmp.lt.s32.totalorder %s113_s7, %s113_s7 }
  0x27   :  { %v49_v1 = vstv %s74_s28  ;;  %p120_p2 = por %p119_p1, %p118_p0 }
  0x28   :  { %v50_v2 = vmul.f32 %v49_v1, %v44_v0  ;;  %v45_v3 = vstv %s41_s30 }
  0x29   :  { %v46_v4 = vmul.f32 %v45_v3, %v44_v0  ;;  %p121_p3 = pnand %p120_p2, %p114_p13 }
  0x2a   :  { %52 = vrot.lane.b32.xlu0 %v50_v2, %s143_s29 }
  0x2b   :  { %v48_v6 = vadd.f32 %v47_v5, %v46_v4 }
  0x9c   :  { %v53_v7 = vpop.permute.xlu0 %52 }
  0x9d   :  { %v55_v8 = vadd.f32 %v53_v7, %v48_v6 }
  0x9f   :  { %57 = vst.msk [vmem:[#allocation8] sm:$0x3f] %vm56_vm0, %v55_v8 }
  0xa0   :  { %124 = shalt.err (!%p121_p3)
}
  0xa1   :  { %s125_s10 = scalar_lea.hbm %s198_s3, 128 }
  0xa2   :  { %p126_p4 = scmp.ne.s32.totalorder %s198_s3, %s125_s10  ;;  %p129_p5 = scmp.lt.u32.totalorder %s125_s10, %s198_s3 }
  0xa4   :  { %p131_p6 = pnand %p129_p5, %p126_p4 }
  0xa6   :  { %134 = shalt.err (!%p131_p6)
}
  0xa7   :  { %67 = dma.vmem_to_hbm [thread:$0]  %s65_s6, 128, %s198_s3, [#allocation5]  }
  0xa8   :  { %139 = dma.done.wait [#allocation5], 128  }
  0xa9   :  { %140 = vsyncadd [#allocation5], 4294967168 }
  0xaa   :  { %71 = vsyncpa [#allocation4], 1 }
  0xab   :  { %72 = vsyncpa [#allocation5], 1 }
  0xac   :  { %73 = vsyncpa [#allocation6], 1 }

</bundles_post_ra>
